<compile_context>
chip_gen: v5e
topology: v5e:2x2
jax: 0.10.0
libtpu: 0.0.40
codegen_flags: <defaults>
</compile_context>

<pallas_src>
import functools

import jax
import jax.numpy as jnp
from jax import lax
from jax.experimental import pallas as pl
from jax.experimental.pallas import tpu as pltpu


# --------------------------------------------------------------------------
# small host-side helpers
# --------------------------------------------------------------------------
def _cdiv(a, b):
    return -(-a // b)


def _round_up(a, m):
    return _cdiv(a, m) * m


def _vmem_budgets():
    """Return (pipeline VMEM budget, vmem_limit_bytes) for this TPU generation."""
    try:
        cap = int(getattr(pltpu.get_tpu_info(), "vmem_capacity_bytes", 0) or 0)
    except Exception:
        cap = 0
    if cap >= (100 << 20):           # v5e / v6e class parts: 128 MiB VMEM
        return 48 << 20, 96 << 20
    return 16 << 20, 44 << 20        # v7x class parts (64 MiB) or unknown


def _min_steps(total_bytes):
    """How many grid steps we want, so DMA/compute overlap + megacore exist."""
    if total_bytes > (32 << 20):
        return 8
    if total_bytes > (2 << 20):
        return 2
    return 1


def _fold_coefficients(params):
    """Fold the six (C,1,1) parameters into a (4, C) array of [A, B, E, F].

    Derivation (matches the PyTorch forward exactly):
      hori_out = a*x + b*mean_W(x),        a = hori_high+1, b = hori_low-a
      vert_l   = a*mean_H(x) + b*mean_HW(x)
      vert_out = c*hori_out + d*vert_l,    c = vert_high+1, d = vert_low-c
      out      = beta*x + gamma*vert_out
               = A*x + B*mean_W(x) + E*mean_H(x) + F*mean_HW(x)
    """
    def g(k):
        return jnp.asarray(params[k], jnp.float32).reshape(-1)

    hl, hh = g("hori_low"), g("hori_high")
    vl, vh = g("vert_low"), g("vert_high")
    gamma, beta = g("gamma"), g("beta")

    a = hh + 1.0
    b = hl - a
    c = vh + 1.0
    d = vl - c

    A = beta + gamma * c * a
    B = gamma * c * b
    E = gamma * d * a
    F = gamma * d * b
    return jnp.stack([A, B, E, F], axis=0)            # (4, C)


# --------------------------------------------------------------------------
# kernels
# --------------------------------------------------------------------------
def _gpsa_flat_kernel(x_ref, coef_ref, o_ref, *, H, W):
    """Lane-dense path.  x_ref/o_ref: (R, H*W); coef_ref: (R, 4) = [A,B,E,F]."""
    L = H * W
    x = x_ref[...].astype(jnp.float32)                # (R, L)
    coef = coef_ref[...].astype(jnp.float32)          # (R, 4)
    A = coef[:, 0:1]
    B = coef[:, 1:2]
    E = coef[:, 2:3]
    F = coef[:, 3:4]

    # Row / column ids for every flattened position, built separately along
    # sublanes and lanes (no in-kernel transpose).  All quantities are small
    # exact integers held in f32; (l + 0.5)/W is never within 0.5/W of an
    # integer, so the floor is exact even for non power-of-two W.
    inv_w = 1.0 / W
    li = lax.broadcasted_iota(jnp.int32, (L, 1), 0).astype(jnp.float32)
    lj = lax.broadcasted_iota(jnp.int32, (1, L), 1).astype(jnp.float32)
    row_i = jnp.floor((li + 0.5) * inv_w)
    row_j = jnp.floor((lj + 0.5) * inv_w)
    col_i = li - row_i * W
    col_j = lj - row_j * W
    h_i = lax.broadcasted_iota(jnp.int32, (H, 1), 0).astype(jnp.float32)
    h_j = lax.broadcasted_iota(jnp.int32, (1, H), 1).astype(jnp.float32)
    w_i = lax.broadcasted_iota(jnp.int32, (W, 1), 0).astype(jnp.float32)
    w_j = lax.broadcasted_iota(jnp.int32, (1, W), 1).astype(jnp.float32)

    # Factored segment matrices (reduce, then broadcast back), so matmul flops
    # stay at 4*(H+W) per element - well under the HBM/MXU balance point.
    s_row = jnp.where(row_i == h_j, inv_w, 0.0)       # (L, H): mean over W
    s_row_t = jnp.where(h_i == row_j, 1.0, 0.0)       # (H, L): broadcast back
    s_col = jnp.where(col_i == w_j, 1.0 / H, 0.0)     # (L, W): mean over H
    s_col_t = jnp.where(w_i == col_j, 1.0, 0.0)       # (W, L): broadcast back

    row_mean = jnp.dot(x, s_row, preferred_element_type=jnp.float32)      # (R, H)
    col_mean = jnp.dot(x, s_col, preferred_element_type=jnp.float32)      # (R, W)
    hw_mean = jnp.mean(x, axis=-1, keepdims=True)                          # (R, 1)

    row_b = jnp.dot(row_mean, s_row_t, preferred_element_type=jnp.float32)  # (R, L)
    col_b = jnp.dot(col_mean, s_col_t, preferred_element_type=jnp.float32)  # (R, L)

    o_ref[...] = (A * x + B * row_b + E * col_b + F * hw_mean).astype(o_ref.dtype)


def _gpsa_nchw_kernel(x_ref, coef_ref, o_ref):
    """Plain NCHW path.  x_ref/o_ref: (NB, TC, H, W); coef_ref: (4, TC, 1, 1)."""
    x = x_ref[...].astype(jnp.float32)
    coef = coef_ref[...].astype(jnp.float32)
    A = coef[0:1]                                      # (1, TC, 1, 1)
    B = coef[1:2]
    E = coef[2:3]
    F = coef[3:4]

    row_mean = jnp.mean(x, axis=-1, keepdims=True)          # (NB, TC, H, 1)
    col_mean = jnp.mean(x, axis=-2, keepdims=True)          # (NB, TC, 1, W)
    hw_mean = jnp.mean(row_mean, axis=-2, keepdims=True)    # (NB, TC, 1, 1)

    out = A * x + B * row_mean + (E * col_mean + F * hw_mean)
    o_ref[...] = out.astype(o_ref.dtype)


# --------------------------------------------------------------------------
# block-size selection
# --------------------------------------------------------------------------
def _pick_flat_rows(NC, H, W, itemsize, budget):
    """Rows per block for the lane-dense path (second-to-last dim, 8-aligned)."""
    L = H * W
    Lp = _round_up(L, 128)
    # per row: double-buffered in + out at I/O dtype, ~3 f32 intermediate
    # planes, plus the lane-padded (rows, 4) coefficient block (2 buffers).
    per_row = 4 * Lp * itemsize + 3 * Lp * 4 + 2 * 128 * 4
    # iota-built segment matrices (f32), charged once.
    fixed = 4 * (L * _round_up(H, 128) + L * _round_up(W, 128)
                 + _round_up(H, 8) * Lp + _round_up(W, 8) * Lp)
    avail = max(budget - fixed, per_row * 8)
    tile = min(NC, avail // per_row)
    tile = min(tile, _cdiv(NC, _min_steps(2 * NC * L * itemsize)))
    if tile >= NC:
        return NC                      # full dim -> exempt from 8-alignment
    return max(8, (tile // 8) * 8)


def _pick_nchw_blocks(N, C, H, W, itemsize, budget):
    """(NB, TILE_C) for the plain NCHW path."""
    Hp = _round_up(H, 8)
    Wp = _round_up(W, 128)
    plane_in = Hp * Wp * itemsize               # padded (H, W) plane, I/O dtype
    plane_f32 = Hp * Wp * 4                     # in-kernel f32 intermediates
    coef_chan = 2 * 4 * (8 * 128 * 4)           # 4 padded (8,128) f32 tiles, x2 buffers
    per_chan = 4 * plane_in + 2 * plane_f32 + coef_chan

    tile_c = max(1, min(C, budget // per_chan))
    nb = 1
    if tile_c >= C:                             # whole-C block fits: pack batch
        tile_c = C
        per_batch = C * (4 * plane_in + 2 * plane_f32)
        rem = budget - C * coef_chan
        nb = max(1, min(N, rem // max(per_batch, 1)))

    # keep enough grid steps for DMA/compute overlap + both TensorCores.
    steps_needed = _min_steps(2 * N * C * H * W * itemsize)
    while _cdiv(C, tile_c) * _cdiv(N, nb) < steps_needed and (nb > 1 or tile_c > 1):
        if nb > 1:
            nb = _cdiv(nb, 2)
        else:
            tile_c = _cdiv(tile_c, 2)
    return nb, tile_c


# --------------------------------------------------------------------------
# public wrapper
# --------------------------------------------------------------------------
_FLAT_MAX_PLANE = 4096   # lane-dense path only while segment matrices stay small


def global_pool_strip_attention(x, params):
    """x: (N, C, H, W); params: dict of (C, 1, 1) arrays (PyTorch layout)."""
    N, C, H, W = x.shape
    L = H * W
    coef = _fold_coefficients(params)                       # (4, C) f32
    itemsize = jnp.dtype(x.dtype).itemsize
    budget, vmem_limit = _vmem_budgets()

    if (W % 128 != 0) and (L <= _FLAT_MAX_PLANE):
        # ------- lane-dense path: view as (N*C, H*W); rows are independent ----
        NC = N * C
        x2 = x.reshape(NC, L)                               # free reshape (NCHW contiguous)
        coef_rows = jnp.broadcast_to(coef.T[None], (N, C, 4)).reshape(NC, 4)
        tile_r = _pick_flat_rows(NC, H, W, itemsize, budget)
        grid = (_cdiv(NC, tile_r),)
        out2 = pl.pallas_call(
            functools.partial(_gpsa_flat_kernel, H=H, W=W),
            out_shape=jax.ShapeDtypeStruct((NC, L), x.dtype),
            grid_spec=pltpu.PrefetchScalarGridSpec(
                num_scalar_prefetch=0,
                grid=grid,
                in_specs=[pl.BlockSpec((tile_r, L), lambda i: (i, 0)),
                          pl.BlockSpec((tile_r, 4), lambda i: (i, 0))],
                out_specs=pl.BlockSpec((tile_r, L), lambda i: (i, 0)),
            ),
            compiler_params=pltpu.CompilerParams(
                dimension_semantics=("parallel",),
                vmem_limit_bytes=vmem_limit,
            ),
        )(x2, coef_rows)
        return out2.reshape(N, C, H, W)

    # ------- plain NCHW path (lane-aligned W, or plane too large) -------------
    # NOTE: assumes one (H, W) plane fits in VMEM (true for the feature-map
    # sizes this module sees); multi-megapixel planes would need an H-tiled
    # two-pass mean.
    nb, tile_c = _pick_nchw_blocks(N, C, H, W, itemsize, budget)
    coef4 = coef[:, :, None, None]                           # (4, C, 1, 1)
    grid = (_cdiv(C, tile_c), _cdiv(N, nb))                  # channel outer, batch inner
    x_spec = pl.BlockSpec((nb, tile_c, H, W), lambda c, n: (n, c, 0, 0))
    coef_spec = pl.BlockSpec((4, tile_c, 1, 1), lambda c, n: (0, c, 0, 0))
    return pl.pallas_call(
        _gpsa_nchw_kernel,
        out_shape=jax.ShapeDtypeStruct((N, C, H, W), x.dtype),
        grid_spec=pltpu.PrefetchScalarGridSpec(
            num_scalar_prefetch=0,
            grid=grid,
            in_specs=[x_spec, coef_spec],
            out_specs=x_spec,
        ),
        compiler_params=pltpu.CompilerParams(
            dimension_semantics=("parallel", "parallel"),
            vmem_limit_bytes=vmem_limit,
        ),
    )(x, coef4)


# --------------------------------------------------------------------------
# reference (direct transcription of the PyTorch forward) and self-test
# --------------------------------------------------------------------------
def _reference(x, params):
    hori_l = jnp.mean(x, axis=-1, keepdims=True)
    hori_h = x - hori_l
    hori_out = params["hori_low"] * hori_l + (params["hori_high"] + 1.0) * hori_h
    vert_l = jnp.mean(hori_out, axis=-2, keepdims=True)
    vert_h = hori_out - vert_l
    vert_out = params["vert_low"] * vert_l + (params["vert_high"] + 1.0) * vert_h
    return x * params["beta"] + vert_out * params["gamma"]


def _make_params(key, C):
    ks = jax.random.split(key, 6)
    return {
        "vert_low":  0.1 * jax.random.normal(ks[0], (C, 1, 1), jnp.float32),
        "vert_high": 0.1 * jax.random.normal(ks[1], (C, 1, 1), jnp.float32),
        "hori_low":  0.1 * jax.random.normal(ks[2], (C, 1, 1), jnp.float32),
        "hori_high": 0.1 * jax.random.normal(ks[3], (C, 1, 1), jnp.float32),
        "gamma":     0.1 * jax.random.normal(ks[4], (C, 1, 1), jnp.float32),
        "beta": jnp.ones((C, 1, 1), jnp.float32)
                + 0.1 * jax.random.normal(ks[5], (C, 1, 1), jnp.float32),
    }


if __name__ == "__main__":
    key = jax.random.PRNGKey(0)

    # (shape, tolerance): first/last shapes take the lane-dense path (means go
    # through MXU contractions; tolerance covers reduced-precision f32 matmul
    # emulation), the middle one takes the plain NCHW path (pure VPU math).
    cases = [
        ((2, 4, 16, 16), 2e-3),    # W < 128        -> lane-dense (flat) path
        ((2, 4, 8, 128), 1e-5),    # W % 128 == 0   -> plain NCHW path
        ((1, 3, 20, 24), 2e-3),    # awkward dims, H != W -> flat path
    ]
    for idx, (shape, tol) in enumerate(cases):
        kx, kp, key = jax.random.split(key, 3)
        N, C, H, W = shape
        x = jax.random.normal(kx, shape, dtype=jnp.float32)
        params = _make_params(kp, C)

        out = jax.block_until_ready(global_pool_strip_attention(x, params))
        ref = _reference(x, params)

        assert out.shape == shape
        err = float(jnp.max(jnp.abs(out - ref)))
        assert jnp.allclose(out, ref, atol=tol, rtol=tol), (
            f"case {idx} {shape}: max abs err {err:.3e}")

    print("KERNEL_OK")
</pallas_src>

<mosaic_0001>
module attributes {stable_mosaic.version = 11 : i64} {
  func.func @_gpsa_flat_kernel(%arg0: i32, %arg1: memref<8x256xf32, #tpu.memory_space<vmem>>, %arg2: memref<8x4xf32, #tpu.memory_space<vmem>>, %arg3: memref<8x256xf32, #tpu.memory_space<vmem>>) attributes {dimension_semantics = [#tpu.dimension_semantics<parallel>], iteration_bounds = array<i64: 1>, scalar_prefetch = 0 : i64, scratch_operands = 0 : i64, tpu.core_type = #tpu.core_type<tc>, window_params = [{transform_indices = @transform_0, window_bounds = array<i64: 8, 256>}, {transform_indices = @transform_1, window_bounds = array<i64: 8, 4>}, {transform_indices = @transform_2, window_bounds = array<i64: 8, 256>}]} {
    %c0 = arith.constant 0 : index
    %c0_0 = arith.constant 0 : index
    %0 = vector.load %arg1[%c0, %c0_0] : memref<8x256xf32, #tpu.memory_space<vmem>>, vector<8x256xf32>
    %c0_1 = arith.constant 0 : index
    %c0_2 = arith.constant 0 : index
    %1 = vector.load %arg2[%c0_1, %c0_2] : memref<8x4xf32, #tpu.memory_space<vmem>>, vector<8x4xf32>
    %2 = vector.extract_strided_slice %1 {offsets = [0, 0], sizes = [8, 1], strides = [1, 1]} : vector<8x4xf32> to vector<8x1xf32>
    %3 = vector.extract_strided_slice %1 {offsets = [0, 1], sizes = [8, 1], strides = [1, 1]} : vector<8x4xf32> to vector<8x1xf32>
    %4 = vector.extract_strided_slice %1 {offsets = [0, 2], sizes = [8, 1], strides = [1, 1]} : vector<8x4xf32> to vector<8x1xf32>
    %5 = vector.extract_strided_slice %1 {offsets = [0, 3], sizes = [8, 1], strides = [1, 1]} : vector<8x4xf32> to vector<8x1xf32>
    %6 = tpu.iota {dimensions = array<i32: 0>} : vector<256x1xi32>
    %7 = arith.sitofp %6 : vector<256x1xi32> to vector<256x1xf32>
    %8 = tpu.iota {dimensions = array<i32: 1>} : vector<1x256xi32>
    %9 = arith.sitofp %8 : vector<1x256xi32> to vector<1x256xf32>
    %cst = arith.constant 5.000000e-01 : f32
    %10 = vector.broadcast %cst : f32 to vector<256x1xf32>
    %11 = arith.addf %7, %10 : vector<256x1xf32>
    %cst_3 = arith.constant 6.250000e-02 : f32
    %12 = vector.broadcast %cst_3 : f32 to vector<256x1xf32>
    %13 = arith.mulf %11, %12 : vector<256x1xf32>
    %14 = math.floor %13 : vector<256x1xf32>
    %cst_4 = arith.constant 5.000000e-01 : f32
    %15 = vector.broadcast %cst_4 : f32 to vector<1x256xf32>
    %16 = arith.addf %9, %15 : vector<1x256xf32>
    %cst_5 = arith.constant 6.250000e-02 : f32
    %17 = vector.broadcast %cst_5 : f32 to vector<1x256xf32>
    %18 = arith.mulf %16, %17 : vector<1x256xf32>
    %19 = math.floor %18 : vector<1x256xf32>
    %cst_6 = arith.constant 1.600000e+01 : f32
    %20 = vector.broadcast %cst_6 : f32 to vector<256x1xf32>
    %21 = arith.mulf %14, %20 : vector<256x1xf32>
    %22 = arith.subf %7, %21 : vector<256x1xf32>
    %cst_7 = arith.constant 1.600000e+01 : f32
    %23 = vector.broadcast %cst_7 : f32 to vector<1x256xf32>
    %24 = arith.mulf %19, %23 : vector<1x256xf32>
    %25 = arith.subf %9, %24 : vector<1x256xf32>
    %26 = tpu.iota {dimensions = array<i32: 0>} : vector<16x1xi32>
    %27 = arith.sitofp %26 : vector<16x1xi32> to vector<16x1xf32>
    %28 = tpu.iota {dimensions = array<i32: 1>} : vector<1x16xi32>
    %29 = arith.sitofp %28 : vector<1x16xi32> to vector<1x16xf32>
    %30 = tpu.iota {dimensions = array<i32: 0>} : vector<16x1xi32>
    %31 = arith.sitofp %30 : vector<16x1xi32> to vector<16x1xf32>
    %32 = tpu.iota {dimensions = array<i32: 1>} : vector<1x16xi32>
    %33 = arith.sitofp %32 : vector<1x16xi32> to vector<1x16xf32>
    %34 = vector.broadcast %14 : vector<256x1xf32> to vector<256x16xf32>
    %35 = vector.broadcast %29 : vector<1x16xf32> to vector<256x16xf32>
    %36 = arith.cmpf oeq, %34, %35 : vector<256x16xf32>
    %cst_8 = arith.constant 6.250000e-02 : f32
    %cst_9 = arith.constant 0.000000e+00 : f32
    %37 = vector.broadcast %cst_8 : f32 to vector<256x16xf32>
    %38 = vector.broadcast %cst_9 : f32 to vector<256x16xf32>
    %39 = arith.select %36, %37, %38 : vector<256x16xi1>, vector<256x16xf32>
    %40 = vector.broadcast %27 : vector<16x1xf32> to vector<16x256xf32>
    %41 = vector.broadcast %19 : vector<1x256xf32> to vector<16x256xf32>
    %42 = arith.cmpf oeq, %40, %41 : vector<16x256xf32>
    %cst_10 = arith.constant 1.000000e+00 : f32
    %cst_11 = arith.constant 0.000000e+00 : f32
    %43 = vector.broadcast %cst_10 : f32 to vector<16x256xf32>
    %44 = vector.broadcast %cst_11 : f32 to vector<16x256xf32>
    %45 = arith.select %42, %43, %44 : vector<16x256xi1>, vector<16x256xf32>
    %46 = vector.broadcast %22 : vector<256x1xf32> to vector<256x16xf32>
    %47 = vector.broadcast %33 : vector<1x16xf32> to vector<256x16xf32>
    %48 = arith.cmpf oeq, %46, %47 : vector<256x16xf32>
    %cst_12 = arith.constant 6.250000e-02 : f32
    %cst_13 = arith.constant 0.000000e+00 : f32
    %49 = vector.broadcast %cst_12 : f32 to vector<256x16xf32>
    %50 = vector.broadcast %cst_13 : f32 to vector<256x16xf32>
    %51 = arith.select %48, %49, %50 : vector<256x16xi1>, vector<256x16xf32>
    %52 = vector.broadcast %31 : vector<16x1xf32> to vector<16x256xf32>
    %53 = vector.broadcast %25 : vector<1x256xf32> to vector<16x256xf32>
    %54 = arith.cmpf oeq, %52, %53 : vector<16x256xf32>
    %cst_14 = arith.constant 1.000000e+00 : f32
    %cst_15 = arith.constant 0.000000e+00 : f32
    %55 = vector.broadcast %cst_14 : f32 to vector<16x256xf32>
    %56 = vector.broadcast %cst_15 : f32 to vector<16x256xf32>
    %57 = arith.select %54, %55, %56 : vector<16x256xi1>, vector<16x256xf32>
    %cst_16 = arith.constant dense<0.000000e+00> : vector<8x16xf32>
    %58 = tpu.matmul %0, %39, %cst_16 {dimension_numbers = #tpu.dot_dimension_numbers<[1], [0], [0], [1], [0, 0, 1, 1], [], []>} : vector<8x256xf32>, vector<256x16xf32>, vector<8x16xf32> -> vector<8x16xf32>
    %cst_17 = arith.constant dense<0.000000e+00> : vector<8x16xf32>
    %59 = tpu.matmul %0, %51, %cst_17 {dimension_numbers = #tpu.dot_dimension_numbers<[1], [0], [0], [1], [0, 0, 1, 1], [], []>} : vector<8x256xf32>, vector<256x16xf32>, vector<8x16xf32> -> vector<8x16xf32>
    %cst_18 = arith.constant dense<0.000000e+00> : vector<8xf32>
    %60 = vector.multi_reduction <add>, %0, %cst_18 [1] : vector<8x256xf32> to vector<8xf32>
    %61 = vector.shape_cast %60 : vector<8xf32> to vector<8x1xf32>
    %cst_19 = arith.constant 2.560000e+02 : f32
    %62 = vector.broadcast %cst_19 : f32 to vector<8x1xf32>
    %63 = arith.divf %61, %62 : vector<8x1xf32>
    %cst_20 = arith.constant dense<0.000000e+00> : vector<8x256xf32>
    %64 = tpu.matmul %58, %45, %cst_20 {dimension_numbers = #tpu.dot_dimension_numbers<[1], [0], [0], [1], [0, 0, 1, 1], [], []>} : vector<8x16xf32>, vector<16x256xf32>, vector<8x256xf32> -> vector<8x256xf32>
    %cst_21 = arith.constant dense<0.000000e+00> : vector<8x256xf32>
    %65 = tpu.matmul %59, %57, %cst_21 {dimension_numbers = #tpu.dot_dimension_numbers<[1], [0], [0], [1], [0, 0, 1, 1], [], []>} : vector<8x16xf32>, vector<16x256xf32>, vector<8x256xf32> -> vector<8x256xf32>
    %66 = vector.broadcast %2 : vector<8x1xf32> to vector<8x256xf32>
    %67 = arith.mulf %66, %0 : vector<8x256xf32>
    %68 = vector.broadcast %3 : vector<8x1xf32> to vector<8x256xf32>
    %69 = arith.mulf %68, %64 : vector<8x256xf32>
    %70 = arith.addf %67, %69 : vector<8x256xf32>
    %71 = vector.broadcast %4 : vector<8x1xf32> to vector<8x256xf32>
    %72 = arith.mulf %71, %65 : vector<8x256xf32>
    %73 = arith.addf %70, %72 : vector<8x256xf32>
    %74 = arith.mulf %5, %63 : vector<8x1xf32>
    %75 = vector.broadcast %74 : vector<8x1xf32> to vector<8x256xf32>
    %76 = arith.addf %73, %75 : vector<8x256xf32>
    %c0_22 = arith.constant 0 : index
    %c0_23 = arith.constant 0 : index
    %77 = vector.load %arg3[%c0_22, %c0_23] : memref<8x256xf32, #tpu.memory_space<vmem>>, vector<8x256xf32>
    tpu.vector_store %arg3[%c0_22, %c0_23], %76 {strides = array<i32>} : memref<8x256xf32, #tpu.memory_space<vmem>>, vector<8x256xf32>,
    return
  }
  func.func @transform_0(%arg0: i32) -> (i32, i32) {
    %c0_i32 = arith.constant 0 : i32
    %c0_i32_0 = arith.constant 0 : i32
    return %arg0, %c0_i32 : i32, i32
  }
  func.func @transform_1(%arg0: i32) -> (i32, i32) {
    %c0_i32 = arith.constant 0 : i32
    %c0_i32_0 = arith.constant 0 : i32
    return %arg0, %c0_i32 : i32, i32
  }
  func.func @transform_2(%arg0: i32) -> (i32, i32) {
    %c0_i32 = arith.constant 0 : i32
    %c0_i32_0 = arith.constant 0 : i32
    return %arg0, %c0_i32 : i32, i32
  }
}

</mosaic_0001>

<bundles_post_ra>
// kernel: tpu_custom_call.1
= control target key start
LH: loop header
LB: loop body
LE: loop exit
PB: predicated region body
PF: predicated region fallthrough
CT: control target
= control target key end

     0   :  { %7 = vsyncpa [#allocation3], 0  ;;  %s1064_s0 = inlined_call_operand.hbm [shape: f32[8,256], index: 0, kind: input, shape index: {}]   ;;  %s1065_s1 = inlined_call_operand.vmem [shape: f32[8,4], index: 1, kind: input, shape index: {}]   ;;  %s1066_s2 = inlined_call_operand.hbm [shape: f32[8,256], index: 2, kind: output, shape index: {}]  }
   0x1   :  { %8 = vsyncpa [#allocation4], 0  ;;  %s14_s11 = sshll.u32 %s1064_s0, 4  ;;  %s785_s12 = smov [#allocation2]   ;;  %v29_v0 = vlaneseq  ;;  %s15_s11 = int_to_ptr.hbm [resolvable:$true] %s14_s11 }
   0x2   :  { %s16_s13 = sshll.u32 %s785_s12, 4  ;;  %s17_s13 = int_to_ptr.vmem [resolvable:$true] %s16_s13 }
   0x3   :  { %19 = dma.hbm_to_vmem [thread:$0]  %s15_s11, 256, %s17_s13, [#allocation3]  }
   0x4   :  { %781 = dma.done.wait [#allocation3], 256  }
   0x5   :  { %782 = vsyncadd [#allocation3], 4294967040  ;;  %v812_v1 = vshrl.u32 %v29_v0, 7  ;;  %v814_v2 = vand.u32 127, %v29_v0  ;;  %v786_v47 = vmov 0.0625   ;;  %s631_s18 = sshll.u32 %s1066_s2, 4  ;;  %s632_s18 = int_to_ptr.hbm [resolvable:$true] %s631_s18 }
   0x7   :  { %v45_v3 = vadd.s32 120, %v812_v1  ;;  %v818_v4 = vcvt.s32.f32 %v814_v2  ;;  %v61_v5 = vadd.s32 248, %v812_v1  ;;  %v44_v6 = vadd.s32 112, %v812_v1 }
   0x8   :  { %v60_v7 = vadd.s32 240, %v812_v1  ;;  %v43_v8 = vadd.s32 104, %v812_v1  ;;  %v59_v9 = vadd.s32 232, %v812_v1  ;;  %v826_v10 = vadd.s32 96, %v812_v1 }
   0x9   :  { %v77_v11 = vcvt.s32.f32 %v45_v3  ;;  %v93_v12 = vcvt.s32.f32 %v61_v5  ;;  %v76_v13 = vcvt.s32.f32 %v44_v6  ;;  %v829_v14 = vadd.s32 224, %v812_v1 }
   0xa   :  { %v92_v15 = vcvt.s32.f32 %v60_v7  ;;  %v75_v16 = vcvt.s32.f32 %v43_v8  ;;  %v91_v17 = vcvt.s32.f32 %v59_v9  ;;  %v74_v18 = vcvt.s32.f32 %v826_v10 }
   0xb   :  { %v114_v19 = vadd.f32 0.5, %v77_v11  ;;  %v130_v20 = vadd.f32 0.5, %v93_v12  ;;  %v113_v21 = vadd.f32 0.5, %v76_v13  ;;  %v90_v22 = vcvt.s32.f32 %v829_v14 }
   0xc   :  { %v129_v23 = vadd.f32 0.5, %v92_v15  ;;  %v112_v24 = vadd.f32 0.5, %v75_v16  ;;  %v128_v25 = vadd.f32 0.5, %v91_v17  ;;  %v111_v26 = vadd.f32 0.5, %v74_v18 }
   0xd   :  { %v146_v27 = vmul.f32 0.0625, %v114_v19  ;;  %v162_v28 = vmul.f32 0.0625, %v130_v20  ;;  %v145_v29 = vmul.f32 0.0625, %v113_v21  ;;  %v127_v30 = vadd.f32 0.5, %v90_v22 }
   0xe   :  { %v161_v31 = vmul.f32 0.0625, %v129_v23  ;;  %v144_v32 = vmul.f32 0.0625, %v112_v24  ;;  %v160_v33 = vmul.f32 0.0625, %v128_v25  ;;  %v143_v34 = vmul.f32 0.0625, %v111_v26 }
   0xf   :  { %v178_v35 = vfloor.f32 %v146_v27  ;;  %v194_v36 = vfloor.f32 %v162_v28  ;;  %v177_v37 = vfloor.f32 %v145_v29  ;;  %v159_v38 = vmul.f32 0.0625, %v127_v30 }
  0x10   :  { %v193_v39 = vfloor.f32 %v161_v31  ;;  %v176_v40 = vfloor.f32 %v144_v32  ;;  %v192_v41 = vfloor.f32 %v160_v33  ;;  %v175_v42 = vfloor.f32 %v143_v34 }
  0x11   :  { %v216_v43 = vmul.f32 16.0, %v178_v35  ;;  %v232_v44 = vmul.f32 16.0, %v194_v36  ;;  %v215_v45 = vmul.f32 16.0, %v177_v37  ;;  %vm284_vm0 = vcmp.eq.f32.partialorder %v178_v35, %v818_v4 }
  0x12   :  { %v231_v46 = vmul.f32 16.0, %v193_v39  ;;  %641 = vmatpush.msk.msra.mxu0 %vm284_vm0, %v786_v47  ;;  %vm300_vm1 = vcmp.eq.f32.partialorder %v194_v36, %v818_v4  ;;  %v214_v48 = vmul.f32 16.0, %v176_v40  ;;  %v230_v49 = vmul.f32 16.0, %v192_v41 }
  0x13   :  { %v248_v50 = vsub.f32 %v77_v11, %v216_v43  ;;  %v264_v51 = vsub.f32 %v93_v12, %v232_v44  ;;  %v247_v52 = vsub.f32 %v76_v13, %v215_v45  ;;  %657 = vmatpush.msk.msra.mxu1 %vm300_vm1, %v786_v47  ;;  %vm283_vm2 = vcmp.eq.f32.partialorder %v177_v37, %v818_v4 }
  0x14   :  { %v263_v53 = vsub.f32 %v92_v15, %v231_v46  ;;  %v246_v54 = vsub.f32 %v75_v16, %v214_v48  ;;  %v262_v55 = vsub.f32 %v91_v17, %v230_v49  ;;  %642 = vmatpush.msk.msra.mxu0 %vm283_vm2, %v786_v47  ;;  %vm299_vm3 = vcmp.eq.f32.partialorder %v193_v39, %v818_v4 }
  0x15   :  { %vm356_vm4 = vcmp.eq.f32.partialorder %v248_v50, %v818_v4  ;;  %vm372_vm5 = vcmp.eq.f32.partialorder %v264_v51, %v818_v4  ;;  %vm355_vm6 = vcmp.eq.f32.partialorder %v247_v52, %v818_v4  ;;  %658 = vmatpush.msk.msra.mxu1 %vm299_vm3, %v786_v47  ;;  %v213_v56 = vmul.f32 16.0, %v175_v42 }
  0x16   :  { %673 = vmatpush.msk.msra.mxu2 %vm356_vm4, %v786_v47  ;;  %689 = vmatpush.msk.msra.mxu3 %vm372_vm5, %v786_v47  ;;  %vm371_vm7 = vcmp.eq.f32.partialorder %v263_v53, %v818_v4  ;;  %vm354_vm8 = vcmp.eq.f32.partialorder %v246_v54, %v818_v4  ;;  %vm370_vm9 = vcmp.eq.f32.partialorder %v262_v55, %v818_v4  ;;  %v191_v57 = vfloor.f32 %v159_v38 }
  0x17   :  { %v245_v58 = vsub.f32 %v74_v18, %v213_v56  ;;  %vm282_vm10 = vcmp.eq.f32.partialorder %v176_v40, %v818_v4  ;;  %vm298_vm11 = vcmp.eq.f32.partialorder %v192_v41, %v818_v4  ;;  %v41_v59 = vadd.s32 88, %v812_v1 }
  0x18   :  { %674 = vmatpush.msk.msra.mxu2 %vm355_vm6, %v786_v47  ;;  %690 = vmatpush.msk.msra.mxu3 %vm371_vm7, %v786_v47  ;;  %v229_v60 = vmul.f32 16.0, %v191_v57  ;;  %v57_v61 = vadd.s32 216, %v812_v1  ;;  %vm281_vm12 = vcmp.eq.f32.partialorder %v175_v42, %v818_v4  ;;  %vm297_vm13 = vcmp.eq.f32.partialorder %v191_v57, %v818_v4 }
  0x19   :  { %vm353_vm14 = vcmp.eq.f32.partialorder %v245_v58, %v818_v4  ;;  %643 = vmatpush.msk.msra.mxu0 %vm282_vm10, %v786_v47  ;;  %659 = vmatpush.msk.msra.mxu1 %vm298_vm11, %v786_v47  ;;  %v73_v62 = vcvt.s32.f32 %v41_v59  ;;  %v40_v63 = vadd.s32 80, %v812_v1  ;;  %v56_v0 = vadd.s32 208, %v812_v1 }
  0x1a   :  { %675 = vmatpush.msk.msra.mxu2 %vm354_vm8, %v786_v47  ;;  %691 = vmatpush.msk.msra.mxu3 %vm370_vm9, %v786_v47  ;;  %v261_v3 = vsub.f32 %v90_v22, %v229_v60  ;;  %v89_v5 = vcvt.s32.f32 %v57_v61  ;;  %v39_v6 = vadd.s32 72, %v812_v1  ;;  %v55_v7 = vadd.s32 200, %v812_v1 }
  0x1b   :  { %v110_v8 = vadd.f32 0.5, %v73_v62  ;;  %644 = vmatpush.msk.msra.mxu0 %vm281_vm12, %v786_v47  ;;  %660 = vmatpush.msk.msra.mxu1 %vm297_vm13, %v786_v47  ;;  %v72_v9 = vcvt.s32.f32 %v40_v63  ;;  %v88_v10 = vcvt.s32.f32 %v56_v0  ;;  %v877_v11 = vadd.s32 64, %v812_v1 }
  0x1c   :  { %676 = vmatpush.msk.msra.mxu2 %vm353_vm14, %v786_v47  ;;  %vm369_vm15 = vcmp.eq.f32.partialorder %v261_v3, %v818_v4  ;;  %v126_v12 = vadd.f32 0.5, %v89_v5  ;;  %v71_v13 = vcvt.s32.f32 %v39_v6  ;;  %v87_v14 = vcvt.s32.f32 %v55_v7 }
  0x1d   :  { %692 = vmatpush.msk.msra.mxu3 %vm369_vm15, %v786_v47  ;;  %v142_v15 = vmul.f32 0.0625, %v110_v8  ;;  %v109_v16 = vadd.f32 0.5, %v72_v9  ;;  %v125_v17 = vadd.f32 0.5, %v88_v10  ;;  %v70_v18 = vcvt.s32.f32 %v877_v11 }
  0x1e   :  { %v158_v19 = vmul.f32 0.0625, %v126_v12  ;;  %v108_v20 = vadd.f32 0.5, %v71_v13  ;;  %v124_v21 = vadd.f32 0.5, %v87_v14  ;;  %v886_v22 = vadd.s32 192, %v812_v1 }
  0x1f   :  { %v174_v23 = vfloor.f32 %v142_v15  ;;  %v141_v24 = vmul.f32 0.0625, %v109_v16  ;;  %v157_v25 = vmul.f32 0.0625, %v125_v17  ;;  %v107_v26 = vadd.f32 0.5, %v70_v18 }
  0x20   :  { %v190_v27 = vfloor.f32 %v158_v19  ;;  %v140_v28 = vmul.f32 0.0625, %v108_v20  ;;  %v156_v29 = vmul.f32 0.0625, %v124_v21  ;;  %v86_v30 = vcvt.s32.f32 %v886_v22 }
  0x21   :  { %v212_v31 = vmul.f32 16.0, %v174_v23  ;;  %v173_v32 = vfloor.f32 %v141_v24  ;;  %v189_v33 = vfloor.f32 %v157_v25  ;;  %vm280_vm0 = vcmp.eq.f32.partialorder %v174_v23, %v818_v4 }
  0x22   :  { %v228_v34 = vmul.f32 16.0, %v190_v27  ;;  %645 = vmatpush.msk.msra.mxu0 %vm280_vm0, %v786_v47  ;;  %vm296_vm1 = vcmp.eq.f32.partialorder %v190_v27, %v818_v4  ;;  %v172_v35 = vfloor.f32 %v140_v28  ;;  %v188_v36 = vfloor.f32 %v156_v29 }
  0x23   :  { %v244_v37 = vsub.f32 %v73_v62, %v212_v31  ;;  %v211_v38 = vmul.f32 16.0, %v173_v32  ;;  %v227_v39 = vmul.f32 16.0, %v189_v33  ;;  %661 = vmatpush.msk.msra.mxu1 %vm296_vm1, %v786_v47  ;;  %vm279_vm2 = vcmp.eq.f32.partialorder %v173_v32, %v818_v4 }
  0x24   :  { %v260_v40 = vsub.f32 %v89_v5, %v228_v34  ;;  %v210_v41 = vmul.f32 16.0, %v172_v35  ;;  %v226_v42 = vmul.f32 16.0, %v188_v36  ;;  %646 = vmatpush.msk.msra.mxu0 %vm279_vm2, %v786_v47  ;;  %vm295_vm3 = vcmp.eq.f32.partialorder %v189_v33, %v818_v4 }
  0x25   :  { %vm352_vm4 = vcmp.eq.f32.partialorder %v244_v37, %v818_v4  ;;  %v243_v43 = vsub.f32 %v72_v9, %v211_v38  ;;  %v259_v44 = vsub.f32 %v88_v10, %v227_v39  ;;  %662 = vmatpush.msk.msra.mxu1 %vm295_vm3, %v786_v47  ;;  %v139_v45 = vmul.f32 0.0625, %v107_v26 }
  0x26   :  { %677 = vmatpush.msk.msra.mxu2 %vm352_vm4, %v786_v47  ;;  %vm368_vm5 = vcmp.eq.f32.partialorder %v260_v40, %v818_v4  ;;  %v242_v46 = vsub.f32 %v71_v13, %v210_v41  ;;  %v258_v48 = vsub.f32 %v87_v14, %v226_v42  ;;  %v123_v49 = vadd.f32 0.5, %v86_v30 }
  0x27   :  { %693 = vmatpush.msk.msra.mxu3 %vm368_vm5, %v786_v47  ;;  %vm351_vm6 = vcmp.eq.f32.partialorder %v243_v43, %v818_v4  ;;  %vm367_vm7 = vcmp.eq.f32.partialorder %v259_v44, %v818_v4  ;;  %v171_v50 = vfloor.f32 %v139_v45  ;;  %vm278_vm8 = vcmp.eq.f32.partialorder %v172_v35, %v818_v4 }
  0x28   :  { %678 = vmatpush.msk.msra.mxu2 %vm351_vm6, %v786_v47  ;;  %vm350_vm9 = vcmp.eq.f32.partialorder %v242_v46, %v818_v4  ;;  %vm366_vm10 = vcmp.eq.f32.partialorder %v258_v48, %v818_v4  ;;  %v155_v51 = vmul.f32 0.0625, %v123_v49  ;;  %647 = vmatpush.msk.msra.mxu0 %vm278_vm8, %v786_v47  ;;  %vm294_vm11 = vcmp.eq.f32.partialorder %v188_v36, %v818_v4 }
  0x29   :  { %694 = vmatpush.msk.msra.mxu3 %vm367_vm7, %v786_v47  ;;  %v209_v52 = vmul.f32 16.0, %v171_v50  ;;  %663 = vmatpush.msk.msra.mxu1 %vm294_vm11, %v786_v47  ;;  %v37_v53 = vadd.s32 56, %v812_v1  ;;  %v53_v54 = vadd.s32 184, %v812_v1  ;;  %vm277_vm12 = vcmp.eq.f32.partialorder %v171_v50, %v818_v4 }
  0x2a   :  { %679 = vmatpush.msk.msra.mxu2 %vm350_vm9, %v786_v47  ;;  %v187_v55 = vfloor.f32 %v155_v51  ;;  %648 = vmatpush.msk.msra.mxu0 %vm277_vm12, %v786_v47  ;;  %v36_v56 = vadd.s32 48, %v812_v1  ;;  %v52_v57 = vadd.s32 176, %v812_v1  ;;  %v923_v58 = vadd.s32 40, %v812_v1 }
  0x2b   :  { %695 = vmatpush.msk.msra.mxu3 %vm366_vm10, %v786_v47  ;;  %v241_v59 = vsub.f32 %v70_v18, %v209_v52  ;;  %v69_v60 = vcvt.s32.f32 %v37_v53  ;;  %v85_v61 = vcvt.s32.f32 %v53_v54  ;;  %v931_v62 = vadd.s32 168, %v812_v1 }
  0x2c   :  { %v225_v63 = vmul.f32 16.0, %v187_v55  ;;  %vm293_vm13 = vcmp.eq.f32.partialorder %v187_v55, %v818_v4  ;;  %v68_v0 = vcvt.s32.f32 %v36_v56  ;;  %v84_v3 = vcvt.s32.f32 %v52_v57 }
  0x2d   :  { %vm349_vm14 = vcmp.eq.f32.partialorder %v241_v59, %v818_v4  ;;  %v106_v5 = vadd.f32 0.5, %v69_v60  ;;  %v122_v6 = vadd.f32 0.5, %v85_v61  ;;  %664 = vmatpush.msk.msra.mxu1 %vm293_vm13, %v786_v47  ;;  %v67_v7 = vcvt.s32.f32 %v923_v58 }
  0x2e   :  { %680 = vmatpush.msk.msra.mxu2 %vm349_vm14, %v786_v47  ;;  %v257_v8 = vsub.f32 %v86_v30, %v225_v63  ;;  %v105_v9 = vadd.f32 0.5, %v68_v0  ;;  %v121_v10 = vadd.f32 0.5, %v84_v3  ;;  %v83_v11 = vcvt.s32.f32 %v931_v62 }
  0x2f   :  { %v138_v12 = vmul.f32 0.0625, %v106_v5  ;;  %v154_v13 = vmul.f32 0.0625, %v122_v6  ;;  %v104_v14 = vadd.f32 0.5, %v67_v7  ;;  %v942_v15 = vadd.s32 32, %v812_v1 }
  0x30   :  { %vm365_vm15 = vcmp.eq.f32.partialorder %v257_v8, %v818_v4  ;;  %v137_v16 = vmul.f32 0.0625, %v105_v9  ;;  %v153_v17 = vmul.f32 0.0625, %v121_v10  ;;  %v120_v18 = vadd.f32 0.5, %v83_v11 }
  0x31   :  { %696 = vmatpush.msk.msra.mxu3 %vm365_vm15, %v786_v47  ;;  %v170_v19 = vfloor.f32 %v138_v12  ;;  %v186_v20 = vfloor.f32 %v154_v13  ;;  %v136_v21 = vmul.f32 0.0625, %v104_v14  ;;  %v66_v22 = vcvt.s32.f32 %v942_v15 }
  0x32   :  { %v169_v23 = vfloor.f32 %v137_v16  ;;  %v185_v24 = vfloor.f32 %v153_v17  ;;  %v152_v25 = vmul.f32 0.0625, %v120_v18  ;;  %v948_v26 = vadd.s32 160, %v812_v1 }
  0x33   :  { %v208_v27 = vmul.f32 16.0, %v170_v19  ;;  %v224_v28 = vmul.f32 16.0, %v186_v20  ;;  %vm276_vm0 = vcmp.eq.f32.partialorder %v170_v19, %v818_v4  ;;  %vm292_vm1 = vcmp.eq.f32.partialorder %v186_v20, %v818_v4 }
  0x34   :  { %v207_v29 = vmul.f32 16.0, %v169_v23  ;;  %v223_v30 = vmul.f32 16.0, %v185_v24  ;;  %649 = vmatpush.msk.msra.mxu0 %vm276_vm0, %v786_v47  ;;  %665 = vmatpush.msk.msra.mxu1 %vm292_vm1, %v786_v47  ;;  %v168_v31 = vfloor.f32 %v136_v21  ;;  %v184_v32 = vfloor.f32 %v152_v25 }
  0x35   :  { %v240_v33 = vsub.f32 %v69_v60, %v208_v27  ;;  %v256_v34 = vsub.f32 %v85_v61, %v224_v28  ;;  %vm275_vm2 = vcmp.eq.f32.partialorder %v169_v23, %v818_v4  ;;  %vm291_vm3 = vcmp.eq.f32.partialorder %v185_v24, %v818_v4 }
  0x36   :  { %v239_v35 = vsub.f32 %v68_v0, %v207_v29  ;;  %v255_v36 = vsub.f32 %v84_v3, %v223_v30  ;;  %v206_v37 = vmul.f32 16.0, %v168_v31  ;;  %v222_v38 = vmul.f32 16.0, %v184_v32  ;;  %650 = vmatpush.msk.msra.mxu0 %vm275_vm2, %v786_v47  ;;  %666 = vmatpush.msk.msra.mxu1 %vm291_vm3, %v786_v47 }
  0x37   :  { %vm348_vm4 = vcmp.eq.f32.partialorder %v240_v33, %v818_v4  ;;  %vm364_vm5 = vcmp.eq.f32.partialorder %v256_v34, %v818_v4  ;;  %v103_v39 = vadd.f32 0.5, %v66_v22  ;;  %v82_v40 = vcvt.s32.f32 %v948_v26 }
  0x38   :  { %681 = vmatpush.msk.msra.mxu2 %vm348_vm4, %v786_v47  ;;  %697 = vmatpush.msk.msra.mxu3 %vm364_vm5, %v786_v47  ;;  %vm347_vm6 = vcmp.eq.f32.partialorder %v239_v35, %v818_v4  ;;  %vm363_vm7 = vcmp.eq.f32.partialorder %v255_v36, %v818_v4  ;;  %v238_v41 = vsub.f32 %v67_v7, %v206_v37  ;;  %v33_v42 = vadd.s32 24, %v812_v1  ;;  %v1017_v35 = vld [vmem:[#allocation2] sm:$0xff]  ;;  %v1019_v36 = vld [vmem:[#allocation2 + $0x8] sm:$0xff] }
  0x39   :  { %v254_v43 = vsub.f32 %v83_v11, %v222_v38  ;;  %v135_v44 = vmul.f32 0.0625, %v103_v39  ;;  %v119_v45 = vadd.f32 0.5, %v82_v40  ;;  %vm274_vm8 = vcmp.eq.f32.partialorder %v168_v31, %v818_v4 }
  0x3a   :  { %682 = vmatpush.msk.msra.mxu2 %vm347_vm6, %v786_v47  ;;  %698 = vmatpush.msk.msra.mxu3 %vm363_vm7, %v786_v47  ;;  %vm346_vm9 = vcmp.eq.f32.partialorder %v238_v41, %v818_v4  ;;  %vm290_vm10 = vcmp.eq.f32.partialorder %v184_v32, %v818_v4  ;;  %v65_v46 = vcvt.s32.f32 %v33_v42  ;;  %v49_v48 = vadd.s32 152, %v812_v1 }
  0x3b   :  { %vm362_vm11 = vcmp.eq.f32.partialorder %v254_v43, %v818_v4  ;;  %v167_v49 = vfloor.f32 %v135_v44  ;;  %v151_v50 = vmul.f32 0.0625, %v119_v45  ;;  %651 = vmatpush.msk.msra.mxu0 %vm274_vm8, %v786_v47  ;;  %667 = vmatpush.msk.msra.mxu1 %vm290_vm10, %v786_v47  ;;  %v32_v51 = vadd.s32 16, %v812_v1 }
  0x3c   :  { %683 = vmatpush.msk.msra.mxu2 %vm346_vm9, %v786_v47  ;;  %699 = vmatpush.msk.msra.mxu3 %vm362_vm11, %v786_v47  ;;  %v102_v52 = vadd.f32 0.5, %v65_v46  ;;  %v81_v53 = vcvt.s32.f32 %v49_v48  ;;  %v48_v54 = vadd.s32 144, %v812_v1  ;;  %v31_v55 = vadd.s32 8, %v812_v1 }
  0x3d   :  { %v205_v56 = vmul.f32 16.0, %v167_v49  ;;  %v183_v57 = vfloor.f32 %v151_v50  ;;  %vm273_vm12 = vcmp.eq.f32.partialorder %v167_v49, %v818_v4  ;;  %v64_v58 = vcvt.s32.f32 %v32_v51 }
  0x3e   :  { %v134_v59 = vmul.f32 0.0625, %v102_v52  ;;  %v118_v60 = vadd.f32 0.5, %v81_v53  ;;  %652 = vmatpush.msk.msra.mxu0 %vm273_vm12, %v786_v47  ;;  %v80_v61 = vcvt.s32.f32 %v48_v54  ;;  %v984_v62 = vcvt.s32.f32 %v31_v55 }
  0x3f   :  { %v237_v63 = vsub.f32 %v66_v22, %v205_v56  ;;  %v221_v0 = vmul.f32 16.0, %v183_v57  ;;  %vm289_vm13 = vcmp.eq.f32.partialorder %v183_v57, %v818_v4  ;;  %v101_v3 = vadd.f32 0.5, %v64_v58 }
  0x40   :  { %v166_v5 = vfloor.f32 %v134_v59  ;;  %v150_v6 = vmul.f32 0.0625, %v118_v60  ;;  %668 = vmatpush.msk.msra.mxu1 %vm289_vm13, %v786_v47  ;;  %v117_v7 = vadd.f32 0.5, %v80_v61  ;;  %v100_v8 = vadd.f32 0.5, %v984_v62 }
  0x41   :  { %vm345_vm14 = vcmp.eq.f32.partialorder %v237_v63, %v818_v4  ;;  %v253_v9 = vsub.f32 %v82_v40, %v221_v0  ;;  %v133_v10 = vmul.f32 0.0625, %v101_v3  ;;  %v47_v11 = vadd.s32 136, %v812_v1 }
  0x42   :  { %684 = vmatpush.msk.msra.mxu2 %vm345_vm14, %v786_v47  ;;  %v204_v12 = vmul.f32 16.0, %v166_v5  ;;  %v182_v13 = vfloor.f32 %v150_v6  ;;  %v149_v14 = vmul.f32 0.0625, %v117_v7  ;;  %vm272_vm15 = vcmp.eq.f32.partialorder %v166_v5, %v818_v4 }
  0x43   :  { %vm361_vm0 = vcmp.eq.f32.partialorder %v253_v9, %v818_v4  ;;  %v165_v15 = vfloor.f32 %v133_v10  ;;  %653 = vmatpush.msk.msra.mxu0 %vm272_vm15, %v786_v47  ;;  %v132_v16 = vmul.f32 0.0625, %v100_v8  ;;  %v79_v17 = vcvt.s32.f32 %v47_v11 }
  0x44   :  { %700 = vmatpush.msk.msra.mxu3 %vm361_vm0, %v786_v47  ;;  %v236_v18 = vsub.f32 %v65_v46, %v204_v12  ;;  %v220_v19 = vmul.f32 16.0, %v182_v13  ;;  %v181_v20 = vfloor.f32 %v149_v14  ;;  %vm288_vm1 = vcmp.eq.f32.partialorder %v182_v13, %v818_v4 }
  0x45   :  { %v203_v21 = vmul.f32 16.0, %v165_v15  ;;  %669 = vmatpush.msk.msra.mxu1 %vm288_vm1, %v786_v47  ;;  %v164_v22 = vfloor.f32 %v132_v16  ;;  %v116_v23 = vadd.f32 0.5, %v79_v17  ;;  %vm271_vm2 = vcmp.eq.f32.partialorder %v165_v15, %v818_v4 }
  0x46   :  { %vm344_vm3 = vcmp.eq.f32.partialorder %v236_v18, %v818_v4  ;;  %v252_v24 = vsub.f32 %v81_v53, %v220_v19  ;;  %v219_v25 = vmul.f32 16.0, %v181_v20  ;;  %654 = vmatpush.msk.msra.mxu0 %vm271_vm2, %v786_v47  ;;  %vm287_vm4 = vcmp.eq.f32.partialorder %v181_v20, %v818_v4 }
  0x47   :  { %685 = vmatpush.msk.msra.mxu2 %vm344_vm3, %v786_v47  ;;  %v235_v26 = vsub.f32 %v64_v58, %v203_v21  ;;  %v202_v27 = vmul.f32 16.0, %v164_v22  ;;  %v148_v28 = vmul.f32 0.0625, %v116_v23  ;;  %670 = vmatpush.msk.msra.mxu1 %vm287_vm4, %v786_v47  ;;  %v1007_v29 = vcvt.s32.f32 %v812_v1 }
  0x48   :  { %vm360_vm5 = vcmp.eq.f32.partialorder %v252_v24, %v818_v4  ;;  %v251_v30 = vsub.f32 %v80_v61, %v219_v25  ;;  %v46_v31 = vadd.s32 128, %v812_v1  ;;  %vm270_vm6 = vcmp.eq.f32.partialorder %v164_v22, %v818_v4 }
  0x49   :  { %701 = vmatpush.msk.msra.mxu3 %vm360_vm5, %v786_v47  ;;  %vm343_vm7 = vcmp.eq.f32.partialorder %v235_v26, %v818_v4  ;;  %v234_v32 = vsub.f32 %v984_v62, %v202_v27  ;;  %v180_v33 = vfloor.f32 %v148_v28  ;;  %v99_v34 = vadd.f32 0.5, %v1007_v29  ;;  %655 = vmatpush.msk.msra.mxu0 %vm270_vm6, %v786_v47 }
  0x4a   :  { %686 = vmatpush.msk.msra.mxu2 %vm343_vm7, %v786_v47  ;;  %vm359_vm8 = vcmp.eq.f32.partialorder %v251_v30, %v818_v4  ;;  %v78_v1 = vcvt.s32.f32 %v46_v31  ;;  %v493_v37 = vadd.f32 %v1019_v36, %v1017_v35  ;;  %v195_v38 = vadd.f32 0.5, %v818_v4 }
  0x4b   :  { %702 = vmatpush.msk.msra.mxu3 %vm359_vm8, %v786_v47  ;;  %vm342_vm9 = vcmp.eq.f32.partialorder %v234_v32, %v818_v4  ;;  %v218_v39 = vmul.f32 16.0, %v180_v33  ;;  %v131_v40 = vmul.f32 0.0625, %v99_v34  ;;  %vm286_vm10 = vcmp.eq.f32.partialorder %v180_v33, %v818_v4 }
  0x4c   :  { %687 = vmatpush.msk.msra.mxu2 %vm342_vm9, %v786_v47  ;;  %v115_v41 = vadd.f32 0.5, %v78_v1  ;;  %671 = vmatpush.msk.msra.mxu1 %vm286_vm10, %v786_v47  ;;  %v197_v42 = vmul.f32 0.0625, %v195_v38  ;;  %v96_v43 = vadd.s32 128, %v814_v2  ;;  %v787_v59 = vmov 1.0  }
  0x4d   :  { %v250_v44 = vsub.f32 %v79_v17, %v218_v39  ;;  %v163_v45 = vfloor.f32 %v131_v40  ;;  %494 = vadd.xlane.f32.xlu0 %v493_v37  ;;  %v790_v63 = vmov 256.0   ;;  %v791_v0 = vmov 3  }
  0x4e   :  { %v147_v46 = vmul.f32 0.0625, %v115_v41  ;;  %v199_v48 = vfloor.f32 %v197_v42  ;;  %v98_v49 = vcvt.s32.f32 %v96_v43  ;;  %731 = vrcp.f32 %v790_v63  ;;  %729 = vset.pattern.permute.xlu2 %v791_v0 }
  0x4f   :  { %vm358_vm11 = vcmp.eq.f32.partialorder %v250_v44, %v818_v4  ;;  %v201_v50 = vmul.f32 16.0, %v163_v45  ;;  %vm269_vm12 = vcmp.eq.f32.partialorder %v163_v45, %v818_v4  ;;  %v792_v6 = vmov 2  }
  0x50   :  { %703 = vmatpush.msk.msra.mxu3 %vm358_vm11, %v786_v47  ;;  %v179_v51 = vfloor.f32 %v147_v46  ;;  %656 = vmatpush.msk.msra.mxu0 %vm269_vm12, %v786_v47  ;;  %v265_v52 = vmul.f32 16.0, %v199_v48  ;;  %v196_v53 = vadd.f32 0.5, %v98_v49  ;;  %vm335_vm2 = vcmp.eq.f32.partialorder %v984_v62, %v199_v48 }
  0x51   :  { %v233_v2 = vsub.f32 %v1007_v29, %v201_v50  ;;  %429 = vmatmul.f32.vlgmr.msra.gmra.mxu0 %v1017_v35  ;;  %vm333_vm4 = vcmp.eq.f32.partialorder %v1007_v29, %v199_v48  ;;  %vm504_vm9 = vcmask 130048  }
  0x52   :  { %v217_v54 = vmul.f32 16.0, %v179_v51  ;;  %vm285_vm13 = vcmp.eq.f32.partialorder %v179_v51, %v818_v4  ;;  %v267_v55 = vsub.f32 %v818_v4, %v265_v52  ;;  %v198_v56 = vmul.f32 0.0625, %v196_v53  ;;  %705 = vmatpush.msk.msrb.mxu0 %vm335_vm2, %v787_v59 }
  0x53   :  { %vm341_vm14 = vcmp.eq.f32.partialorder %v233_v2, %v818_v4  ;;  %672 = vmatpush.msk.msra.mxu1 %vm285_vm13, %v786_v47 }
  0x54   :  { %688 = vmatpush.msk.msra.mxu2 %vm341_vm14, %v786_v47  ;;  %v249_v57 = vsub.f32 %v78_v1, %v217_v54  ;;  %449 = vmatmul.f32.vlgmr.msra.gmra.mxu1 %v1019_v36  ;;  %vm407_vm15 = vcmp.eq.f32.partialorder %v984_v62, %v267_v55  ;;  %v200_v58 = vfloor.f32 %v198_v56  ;;  %vm405_vm6 = vcmp.eq.f32.partialorder %v1007_v29, %v267_v55  ;;  %v732_v3 = vpop.eup %731 }
  0x55   :  { %469 = vmatmul.f32.vlgmr.msra.gmra.mxu2 %v1017_v35  ;;  %706 = vmatpush.msk.msrb.mxu0 %vm333_vm4, %v787_v59  ;;  %v497_v5 = vmul.f32 256.0, %v732_v3  ;;  %vm501_vm8 = vweird.f32 %v732_v3 }
  0x56   :  { %vm357_vm0 = vcmp.eq.f32.partialorder %v249_v57, %v818_v4  ;;  %711 = vmatpush.msk.msrb.mxu2 %vm407_vm15, %v787_v59  ;;  %v266_v60 = vmul.f32 16.0, %v200_v58  ;;  %vm336_vm3 = vcmp.eq.f32.partialorder %v984_v62, %v200_v58  ;;  %vm334_vm5 = vcmp.eq.f32.partialorder %v1007_v29, %v200_v58  ;;  %v28_v4 = vld [vmem:[%s1065_s1] sm:$0xff]  ;;  %s793_s1 = smov [#allocation5]  }
  0x57   :  { %704 = vmatpush.msk.msra.mxu3 %vm357_vm0, %v786_v47  ;;  %708 = vmatpush.msk.msrb.mxu1 %vm336_vm3, %v787_v59  ;;  %v788_v47 = vmov 1   ;;  %v498_v7 = vsub.f32 1.0, %v497_v5  ;;  %s629_s15 = sshll.u32 %s793_s1, 4  ;;  %s630_s15 = int_to_ptr.vmem [resolvable:$true] %s629_s15 }
  0x58   :  { %489 = vmatmul.f32.vlgmr.msra.gmra.mxu3 %v1019_v36  ;;  %v268_v61 = vsub.f32 %v98_v49, %v266_v60  ;;  %712 = vmatpush.msk.msrb.mxu2 %vm405_vm6, %v787_v59 }
  0x59   :  { %709 = vmatpush.msk.msrb.mxu1 %vm334_vm5, %v787_v59  ;;  %727 = vset.pattern.permute.xlu1 %v788_v47  ;;  %v499_v8 = vmul.f32 %v732_v3, %v498_v7 }
  0x5a   :  { %vm408_vm1 = vcmp.eq.f32.partialorder %v984_v62, %v268_v61  ;;  %vm406_vm7 = vcmp.eq.f32.partialorder %v1007_v29, %v268_v61  ;;  %v789_v62 = vmov 0   ;;  %599 = vperm.xlu1 %727, %v28_v4  }
  0x5b   :  { %714 = vmatpush.msk.msrb.mxu3 %vm408_vm1, %v787_v59  ;;  %726 = vset.pattern.permute.xlu0 %v789_v62  ;;  %v500_v9 = vadd.f32 %v732_v3, %v499_v8 }
  0x5d   :  { %715 = vmatpush.msk.msrb.mxu3 %vm406_vm7, %v787_v59  ;;  %v502_v11 = vsel %vm501_vm8, %v732_v3, %v500_v9 }
  0x61   :  { %593 = vperm.xlu0 %726, %v28_v4  }
  0x62   :  { %728 = vset.pattern.permute.xlu1 %v792_v6 }
  0x63   :  { %607 = vperm.xlu1 %728, %v28_v4  }
  0x69   :  { %730 = vset.pattern.permute.xlu0 %v791_v0 }
  0xc0   :  { %v495_v10 = vpop.xlane.xlu0 %494 }
  0xc1   :  { %v503_v13 = vmul.f32 %v502_v11, %v495_v10 }
  0xc3   :  { %v614_v15 = vmul.f32 %v503_v13, %v28_v4 }
  0xc5   :  { %617 = vperm.xlu2 %729, %v614_v15  }
  0xcc   :  { %v600_v20 = vpop.permute.xlu1 %599 }
  0xce   :  { %v430_v12 = vpop.f32.mrf.mxu0 }
  0xd1   :  { %v450_v14 = vpop.f32.mrf.mxu1 }
  0xd2   :  { %v451_v16 = vadd.f32 %v450_v14, %v430_v12 }
  0xd3   :  { %v594_v21 = vpop.permute.xlu0 %593 }
  0xd4   :  { %707 = vmatmul.msk.f32.vlgmr.msrb.gmra.mxu0 %vm504_vm9, %v451_v16  ;;  %710 = vmatmul.msk.f32.vlgmr.msrb.gmra.mxu1 %vm504_vm9, %v451_v16  ;;  %v596_v24 = vmul.f32 %v594_v21, %v1017_v35  ;;  %v597_v25 = vmul.f32 %v594_v21, %v1019_v36 }
  0xd5   :  { %v608_v28 = vpop.permute.xlu1 %607 }
  0xd8   :  { %v470_v17 = vpop.f32.mrf.mxu2 }
  0xdb   :  { %v490_v18 = vpop.f32.mrf.mxu3 }
  0xdc   :  { %v491_v19 = vadd.f32 %v490_v18, %v470_v17 }
  0xde   :  { %713 = vmatmul.msk.f32.vlgmr.msrb.gmra.mxu2 %vm504_vm9, %v491_v19  ;;  %716 = vmatmul.msk.f32.vlgmr.msrb.gmra.mxu3 %vm504_vm9, %v491_v19 }
 0x11f   :  { %v618_v1 = vpop.permute.xlu2 %617 }
 0x151   :  { %v525_v22 = vpop.f32.mrf.mxu0  ;;  %v545_v23 = vpop.f32.mrf.mxu1 }
 0x152   :  { %v602_v26 = vmul.f32 %v600_v20, %v525_v22  ;;  %v603_v27 = vmul.f32 %v600_v20, %v545_v23 }
 0x154   :  { %v604_v31 = vadd.f32 %v602_v26, %v596_v24  ;;  %v605_v32 = vadd.f32 %v603_v27, %v597_v25 }
 0x161   :  { %v568_v29 = vpop.f32.mrf.mxu2  ;;  %v588_v30 = vpop.f32.mrf.mxu3 }
 0x162   :  { %v610_v33 = vmul.f32 %v608_v28, %v568_v29  ;;  %v611_v34 = vmul.f32 %v608_v28, %v588_v30 }
 0x164   :  { %v612_v37 = vadd.f32 %v610_v33, %v604_v31  ;;  %v613_v38 = vadd.f32 %v611_v34, %v605_v32 }
 0x166   :  { %v620_v35 = vadd.f32 %v618_v1, %v612_v37  ;;  %v621_v36 = vadd.f32 %v618_v1, %v613_v38 }
 0x168   :  { %622 = vst [vmem:[#allocation5] sm:$0xff] %v620_v35 }
 0x169   :  { %623 = vst [vmem:[#allocation5 + $0x8] sm:$0xff] %v621_v36 }
 0x16a   :  { %634 = dma.vmem_to_hbm [thread:$0]  %s630_s15, 256, %s632_s18, [#allocation4]  }
 0x16b   :  { %783 = dma.done.wait [#allocation4], 256  }
 0x16c   :  { %784 = vsyncadd [#allocation4], 4294967040 }
 0x16d   :  { %639 = vsyncpa [#allocation3], 1 }
 0x16e   :  { %640 = vsyncpa [#allocation4], 1 }

</bundles_post_ra>
